<compile_context>
chip_gen: v6e
topology: v6e:2x2x1
jax: 0.10.0
libtpu: 0.0.40
codegen_flags: <defaults>
</compile_context>

<pallas_src>
import functools

import jax
import jax.numpy as jnp
from jax.experimental import pallas as pl
from jax.experimental.pallas import tpu as pltpu


def _nll_loss_kernel(yp_ref, yt_ref, out_ref, acc_ref, *, inv_c):
    k = pl.program_id(1)  # class/reduction grid axis (last, "arbitrary")

    @pl.when(k == 0)
    def _init():
        acc_ref[...] = jnp.zeros_like(acc_ref)

    # Upcast to f32 for the transcendentals / accumulation (bf16-safe on all
    # generations; no-op for f32 inputs).
    yp = yp_ref[...].astype(jnp.float32)
    yt = yt_ref[...].astype(jnp.float32)

    log_yp = jnp.log(yp)
    log_1m = jnp.log(1.0 - log_yp)  # NOTE: reference really uses log(1 - log(yp))
    # yt*log_yp + (1 - yt)*log_1m  ==  yt*(log_yp - log_1m) + log_1m
    vals = yt * (log_yp - log_1m) + log_1m

    acc_ref[...] += jnp.sum(vals, axis=1, keepdims=True)

    @pl.when(k == pl.num_programs(1) - 1)
    def _finalize():
        out_ref[...] = (acc_ref[...] * inv_c).astype(out_ref.dtype)


def _round_up(x, m):
    return ((x + m - 1) // m) * m


def nll_loss(yp, yt, *, max_block_rows=512, max_block_cols=1024):
    """mean(yt*log(yp) + (1-yt)*log(1-log(yp)), axis=1) -> shape (B,)."""
    assert yp.shape == yt.shape and yp.ndim == 2
    B, C = yp.shape
    dtype = yp.dtype
    itemsize = jnp.dtype(dtype).itemsize

    # Class-axis tile: keep the full row in one block when moderate; tile in
    # 128-lane multiples otherwise (keeps tiles within the VMEM budget).
    if C <= max_block_cols:
        TC, C_pad = C, C
    else:
        TC = max_block_cols  # multiple of 128
        C_pad = _round_up(C, TC)

    # Batch-axis tile: big blocks for pipelining; multiple of 8 sublanes.
    if B <= max_block_rows:
        TB, B_pad = B, B
    else:
        TB = max_block_rows  # multiple of 8
        B_pad = _round_up(B, TB)

    if (B_pad, C_pad) != (B, C):
        # Pad with yp=1, yt=1:  1*log(1) + 0*log(1-0) == 0, so padded lanes
        # contribute exactly zero to the row sum (no in-kernel mask needed).
        yp = jnp.pad(yp, ((0, B_pad - B), (0, C_pad - C)), constant_values=1.0)
        yt = jnp.pad(yt, ((0, B_pad - B), (0, C_pad - C)), constant_values=1.0)

    grid = (B_pad // TB, C_pad // TC)
    inv_c = 1.0 / float(C)  # divide by the REAL number of classes

    kernel = functools.partial(_nll_loss_kernel, inv_c=inv_c)

    out = pl.pallas_call(
        kernel,
        out_shape=jax.ShapeDtypeStruct((B_pad, 1), dtype),
        grid_spec=pltpu.PrefetchScalarGridSpec(
            num_scalar_prefetch=0,
            grid=grid,
            in_specs=[
                pl.BlockSpec((TB, TC), lambda i, k: (i, k)),
                pl.BlockSpec((TB, TC), lambda i, k: (i, k)),
            ],
            # Same output block across the reduction axis -> stays resident.
            # TODO(synk): if the (TB, 1) masked narrow store ever shows up in
            # profiles, switch to a lane-dense (tiles, TB) output slab.
            out_specs=pl.BlockSpec((TB, 1), lambda i, k: (i, 0)),
            scratch_shapes=[pltpu.VMEM((TB, 1), jnp.float32)],
        ),
        compiler_params=pltpu.CompilerParams(
            dimension_semantics=("parallel", "arbitrary"),
        ),
        cost_estimate=pl.CostEstimate(
            flops=5 * B_pad * C_pad,
            transcendentals=2 * B_pad * C_pad,
            bytes_accessed=2 * B_pad * C_pad * itemsize + B_pad * itemsize,
        ),
    )(yp, yt)

    # mean over dim=1 of a 2-D tensor gives shape (B,) in PyTorch
    return out[:B, 0]


def nll_loss_ref(yp, yt):
    term1 = yt * jnp.log(yp)
    term2 = (jnp.ones_like(yt) - yt) * jnp.log(jnp.ones_like(yp) - jnp.log(yp))
    return jnp.mean(term1 + term2, axis=1)


if __name__ == "__main__":
    key = jax.random.PRNGKey(0)
    k1, k2, k3, k4 = jax.random.split(key, 4)

    # Case 1: original small demo shape (single block, no padding path).
    B, C = 8, 32
    # yp must be in (0, 1) so log(yp) is finite (and 1 - log(yp) > 0).
    yp = jax.random.uniform(k1, (B, C), jnp.float32, minval=0.05, maxval=0.95)
    yt = jax.random.uniform(k2, (B, C), jnp.float32, minval=0.0, maxval=1.0)
    out = nll_loss(yp, yt)
    jax.block_until_ready(out)
    ref = nll_loss_ref(yp, yt)
    assert out.shape == (B,)
    assert jnp.allclose(out, ref, atol=1e-5, rtol=1e-5), (out, ref)

    # Case 2: exercise the tiled path (batch grid + class-axis reduction grid
    # + zero-contribution padding) with small forced tile sizes.
    B2, C2 = 20, 200
    yp2 = jax.random.uniform(k3, (B2, C2), jnp.float32, minval=0.05, maxval=0.95)
    yt2 = jax.random.uniform(k4, (B2, C2), jnp.float32, minval=0.0, maxval=1.0)
    out2 = nll_loss(yp2, yt2, max_block_rows=8, max_block_cols=128)
    jax.block_until_ready(out2)
    ref2 = nll_loss_ref(yp2, yt2)
    assert out2.shape == (B2,)
    assert jnp.allclose(out2, ref2, atol=1e-5, rtol=1e-5), (out2, ref2)

    print("KERNEL_OK")
</pallas_src>

<mosaic_0001>
module attributes {stable_mosaic.version = 11 : i64} {
  func.func @_nll_loss_kernel(%arg0: i32, %arg1: i32, %arg2: memref<8x32xf32, #tpu.memory_space<vmem>>, %arg3: memref<8x32xf32, #tpu.memory_space<vmem>>, %arg4: memref<8x1xf32, #tpu.memory_space<vmem>>, %arg5: memref<8x1xf32, #tpu.memory_space<vmem>>) attributes {dimension_semantics = [#tpu.dimension_semantics<parallel>, #tpu.dimension_semantics<arbitrary>], iteration_bounds = array<i64: 1, 1>, scalar_prefetch = 0 : i64, scratch_operands = 1 : i64, tpu.core_type = #tpu.core_type<tc>, window_params = [{transform_indices = @transform_0, window_bounds = array<i64: 8, 32>}, {transform_indices = @transform_1, window_bounds = array<i64: 8, 32>}, {transform_indices = @transform_2, window_bounds = array<i64: 8, 1>}]} {
    %c0_i32 = arith.constant 0 : i32
    %0 = arith.cmpi eq, %arg1, %c0_i32 : i32
    %1 = arith.extui %0 : i1 to i32
    %c0_i32_0 = arith.constant 0 : i32
    %2 = arith.cmpi ne, %1, %c0_i32_0 : i32
    scf.if %2 {
      %cst_11 = arith.constant 0.000000e+00 : f32
      %20 = vector.broadcast %cst_11 : f32 to vector<8x1xf32>
      %c0_12 = arith.constant 0 : index
      %c0_13 = arith.constant 0 : index
      %21 = vector.load %arg5[%c0_12, %c0_13] : memref<8x1xf32, #tpu.memory_space<vmem>>, vector<8x1xf32>
      tpu.vector_store %arg5[%c0_12, %c0_13], %20 {strides = array<i32>} : memref<8x1xf32, #tpu.memory_space<vmem>>, vector<8x1xf32>,
    } else {
    }
    %c0 = arith.constant 0 : index
    %c0_1 = arith.constant 0 : index
    %3 = vector.load %arg2[%c0, %c0_1] : memref<8x32xf32, #tpu.memory_space<vmem>>, vector<8x32xf32>
    %c0_2 = arith.constant 0 : index
    %c0_3 = arith.constant 0 : index
    %4 = vector.load %arg3[%c0_2, %c0_3] : memref<8x32xf32, #tpu.memory_space<vmem>>, vector<8x32xf32>
    %5 = math.log %3 : vector<8x32xf32>
    %cst = arith.constant 1.000000e+00 : f32
    %6 = vector.broadcast %cst : f32 to vector<8x32xf32>
    %7 = arith.subf %6, %5 : vector<8x32xf32>
    %8 = math.log %7 : vector<8x32xf32>
    %9 = arith.subf %5, %8 : vector<8x32xf32>
    %10 = arith.mulf %4, %9 : vector<8x32xf32>
    %11 = arith.addf %10, %8 : vector<8x32xf32>
    %c0_4 = arith.constant 0 : index
    %c0_5 = arith.constant 0 : index
    %12 = vector.load %arg5[%c0_4, %c0_5] : memref<8x1xf32, #tpu.memory_space<vmem>>, vector<8x1xf32>
    %cst_6 = arith.constant dense<0.000000e+00> : vector<8xf32>
    %13 = vector.multi_reduction <add>, %11, %cst_6 [1] : vector<8x32xf32> to vector<8xf32>
    %14 = vector.shape_cast %13 : vector<8xf32> to vector<8x1xf32>
    %15 = arith.addf %12, %14 : vector<8x1xf32>
    %c0_7 = arith.constant 0 : index
    %c0_8 = arith.constant 0 : index
    %16 = vector.load %arg5[%c0_7, %c0_8] : memref<8x1xf32, #tpu.memory_space<vmem>>, vector<8x1xf32>
    tpu.vector_store %arg5[%c0_7, %c0_8], %15 {strides = array<i32>} : memref<8x1xf32, #tpu.memory_space<vmem>>, vector<8x1xf32>,
    %c0_i32_9 = arith.constant 0 : i32
    %17 = arith.cmpi eq, %arg1, %c0_i32_9 : i32
    %18 = arith.extui %17 : i1 to i32
    %c0_i32_10 = arith.constant 0 : i32
    %19 = arith.cmpi ne, %18, %c0_i32_10 : i32
    scf.if %19 {
      %c0_11 = arith.constant 0 : index
      %c0_12 = arith.constant 0 : index
      %20 = vector.load %arg5[%c0_11, %c0_12] : memref<8x1xf32, #tpu.memory_space<vmem>>, vector<8x1xf32>
      %cst_13 = arith.constant 3.125000e-02 : f32
      %21 = vector.broadcast %cst_13 : f32 to vector<8x1xf32>
      %22 = arith.mulf %20, %21 : vector<8x1xf32>
      %c0_14 = arith.constant 0 : index
      %c0_15 = arith.constant 0 : index
      %23 = vector.load %arg4[%c0_14, %c0_15] : memref<8x1xf32, #tpu.memory_space<vmem>>, vector<8x1xf32>
      tpu.vector_store %arg4[%c0_14, %c0_15], %22 {strides = array<i32>} : memref<8x1xf32, #tpu.memory_space<vmem>>, vector<8x1xf32>,
    } else {
    }
    return
  }
  func.func @transform_0(%arg0: i32, %arg1: i32) -> (i32, i32) {
    %c0_i32 = arith.constant 0 : i32
    return %arg0, %arg1 : i32, i32
  }
  func.func @transform_1(%arg0: i32, %arg1: i32) -> (i32, i32) {
    %c0_i32 = arith.constant 0 : i32
    return %arg0, %arg1 : i32, i32
  }
  func.func @transform_2(%arg0: i32, %arg1: i32) -> (i32, i32) {
    %c0_i32 = arith.constant 0 : i32
    %c0_i32_0 = arith.constant 0 : i32
    return %arg0, %c0_i32 : i32, i32
  }
}

</mosaic_0001>

<bundles_post_ra>
// kernel: tpu_custom_call.1
= control target key start
LH: loop header
LB: loop body
LE: loop exit
PB: predicated region body
PF: predicated region fallthrough
CT: control target
= control target key end

     0   :  { %7 = vsyncpa [#allocation4], 0  ;;  %s152_s0 = inlined_call_operand.hbm [shape: f32[8,32], index: 0, kind: input, shape index: {}]   ;;  %s153_s1 = inlined_call_operand.hbm [shape: f32[8,32], index: 1, kind: input, shape index: {}]   ;;  %s154_s2 = inlined_call_operand.vmem [shape: f32[8,1], index: 2, kind: output, shape index: {}]  }
   0x1   :  { %8 = vsyncpa [#allocation6], 0  ;;  %s122_s9 = smov [#allocation3]   ;;  %s123_s11 = smov [#allocation5]  }
   0x2   :  { %s15_s10 = sshll.u32 %s122_s9, 4  ;;  %s25_s12 = sshll.u32 %s123_s11, 4  ;;  %s16_s10 = int_to_ptr.vmem [resolvable:$true] %s15_s10  ;;  %s26_s12 = int_to_ptr.vmem [resolvable:$true] %s25_s12 }
   0x3   :  { %s86_s13 = scalar_lea.vmem %s16_s10, 128  ;;  %p91_p1 = scmp.lt.s32.totalorder %s16_s10, %s16_s10 }
   0x4   :  { %p87_p0 = scmp.ne.s32.totalorder %s16_s10, %s86_s13  ;;  %p92_p2 = scmp.lt.s32.totalorder %s86_s13, %s86_s13 }
   0x6   :  { %p93_p3 = por %p92_p2, %p91_p1 }
   0x8   :  { %p94_p4 = pnand %p93_p3, %p87_p0 }
   0xa   :  { %97 = shalt.err (!%p94_p4)
}
   0xb   :  { %18 = dma.hbm_to_vmem [thread:$0]  %s152_s0, 128, %s16_s10, [#allocation4]  }
   0xc   :  { %s106_s16 = scalar_lea.vmem %s26_s12, 128  ;;  %p111_p6 = scmp.lt.s32.totalorder %s26_s12, %s26_s12 }
   0xd   :  { %p107_p5 = scmp.ne.s32.totalorder %s26_s12, %s106_s16  ;;  %p112_p7 = scmp.lt.s32.totalorder %s106_s16, %s106_s16 }
   0xf   :  { %p113_p8 = por %p112_p7, %p111_p6 }
  0x11   :  { %p114_p9 = pnand %p113_p8, %p107_p5 }
  0x13   :  { %117 = shalt.err (!%p114_p9)
}
  0x14   :  { %28 = dma.hbm_to_vmem [thread:$0]  %s153_s1, 128, %s26_s12, [#allocation6]  }
  0x15   :  { %118 = dma.done.wait [#allocation4], 128  }
  0x16   :  { %119 = vsyncadd [#allocation4], 4294967168 }
  0x17   :  { %120 = dma.done.wait [#allocation6], 128  }
  0x18   :  { %121 = vsyncadd [#allocation6], 4294967168  ;;  %vm39_vm0 = vcmask 7168   ;;  %v124_v0 = vmov 0.0   ;;  %v41_v1 = vld [vmem:[#allocation3] sm:$0xff]  ;;  %v42_v7 = vld [vmem:[#allocation5] sm:$0xff] }
  0x19   :  { %40 = vst.msk [vmem:[#allocation2] sm:$0xff] %vm39_vm0, %v124_v0  ;;  %74 = vlog2.f32 %v41_v1  ;;  %vm52_vm1 = vcmask 261120  }
  0x20   :  { %v51_v12 = vld [vmem:[#allocation2] sm:$0xff] }
  0x26   :  { %v75_v2 = vpop.eup %74 }
  0x27   :  { %v44_v3 = vmul.f32 0.6931472, %v75_v2 }
  0x29   :  { %v45_v4 = vsub.f32 1.0, %v44_v3 }
  0x2b   :  { %76 = vlog2.f32 %v45_v4 }
  0x38   :  { %v77_v5 = vpop.eup %76 }
  0x39   :  { %v47_v6 = vmul.f32 0.6931472, %v77_v5 }
  0x3b   :  { %v48_v8 = vsub.f32 %v44_v3, %v47_v6 }
  0x3d   :  { %v49_v9 = vmul.f32 %v48_v8, %v42_v7 }
  0x3f   :  { %v50_v10 = vadd.f32 %v49_v9, %v47_v6 }
  0x41   :  { %v53_v11 = vsel %vm52_vm1, %v50_v10, 0.0 }
  0x42   :  { %54 = vadd.xlane.f32.xlu0 %v53_v11 }
  0xcb   :  { %v55_v13 = vpop.xlane.xlu0 %54 }
  0xcc   :  { %v56_v14 = vadd.f32 %v55_v13, %v51_v12 }
  0xce   :  { %58 = vst.msk [vmem:[#allocation2] sm:$0xff] %vm39_vm0, %v56_v14 }
  0xd5   :  { %v62_v15 = vld [vmem:[#allocation2] sm:$0xff] }
  0xd6   :  { %v63_v16 = vmul.f32 0.03125, %v62_v15 }
  0xd8   :  { %64 = vst.msk [vmem:[%s154_s2] sm:$0xff] %vm39_vm0, %v63_v16 }
  0xd9   :  { %69 = vsyncpa [#allocation4], 1 }
  0xda   :  { %70 = vsyncpa [#allocation6], 1 }

</bundles_post_ra>
